<compile_context>
chip_gen: v6e
topology: v6e:2x2x1
jax: 0.10.0
libtpu: 0.0.40
codegen_flags: <defaults>
</compile_context>

<pallas_src>
import functools

import numpy as np
import jax
import jax.numpy as jnp
from jax.experimental import pallas as pl
from jax.experimental.pallas import tpu as pltpu

_LANES = 128


def _round_up(x: int, m: int) -> int:
    return (x + m - 1) // m * m


def _choose_row_tile(n_rows: int, d_eff: int, itemsize: int,
                     target_block_bytes: int = 2 << 20,
                     vmem_budget_bytes: int = 12 << 20) -> int:
    """Pick a row tile: ~2 MiB blocks so per-step HBM time dominates the
    ~0.35us grid overhead, capped so double-buffered in+out (~4*tn*row_bytes)
    stays well inside the default scoped-VMEM limit on all generations."""
    row_bytes = d_eff * itemsize
    tn = min(target_block_bytes // row_bytes,
             vmem_budget_bytes // (4 * row_bytes))
    tn = max(8, (tn // 8) * 8)                 # sublane multiple
    tn = min(tn, _round_up(n_rows, 8))
    # v7x megacore: don't collapse a big bucket into a single block — split in
    # two so a "parallel" 1-D grid shards across both TensorCores.
    if tn >= n_rows and n_rows * row_bytes > (1 << 20):
        tn = _round_up((n_rows + 1) // 2, 8)
    return tn


def _ln_rows_kernel(x_ref, o_ref, *, eps, inv_d):
    """Fallback path: per-row LayerNorm, D on the lane axis (one-pass stats)."""
    x = x_ref[...].astype(jnp.float32)
    mean = jnp.sum(x, axis=-1, keepdims=True) * inv_d       # XLU reduction
    ex2 = jnp.sum(x * x, axis=-1, keepdims=True) * inv_d    # independent XLU reduction
    var = jnp.maximum(ex2 - mean * mean, 0.0)
    inv = jax.lax.rsqrt(var + eps)                           # EUP (free slot)
    o_ref[...] = ((x - mean) * inv).astype(o_ref.dtype)


def _ln_folded_kernel(x_ref, m_ref, o_ref, *, eps):
    """Lane-dense path: each 128-lane row holds R original rows of width D.

    m_ref is a resident (128,128) block-diagonal matrix with 1/D in each DxD
    block, so x @ M gives every D-lane segment its own mean broadcast back
    across its lanes (runs on the otherwise-idle MXU)."""
    x = x_ref[...].astype(jnp.float32)
    m = m_ref[...]
    mean = jnp.dot(x, m, preferred_element_type=jnp.float32)
    ex2 = jnp.dot(x * x, m, preferred_element_type=jnp.float32)
    var = jnp.maximum(ex2 - mean * mean, 0.0)
    inv = jax.lax.rsqrt(var + eps)                           # EUP (free slot)
    o_ref[...] = ((x - mean) * inv).astype(o_ref.dtype)


def tree_layer_norm(h, *, eps: float = 1e-5):
    """LayerNorm over the last dim of node features h: [N, D].

    Matches torch.nn.LayerNorm(D)(h) with default (fresh) parameters
    (gamma=1, beta=0, biased variance, eps inside the sqrt). Stats are always
    computed in f32; bf16 inputs are accepted at the boundary to halve HBM
    traffic when the surrounding model tolerates it.
    """
    N, D = h.shape
    dtype = h.dtype
    itemsize = jnp.dtype(dtype).itemsize
    eps = float(eps)

    # Lane-dense fold when D is a small divisor of 128 and rows fold evenly.
    fold = (D < _LANES) and (_LANES % D == 0) and (N % (_LANES // D) == 0)
    if fold:
        r = _LANES // D
        rows, d_eff = N // r, _LANES
        x = h.reshape(rows, d_eff)              # free for contiguous row-major
    else:
        r, rows, d_eff, x = 1, N, D, h

    tn = _choose_row_tile(rows, d_eff, itemsize)
    grid = (pl.cdiv(rows, tn),)                  # partial last block allowed

    in_specs = [pl.BlockSpec((tn, d_eff), lambda i: (i, 0))]
    operands = [x]
    if fold:
        seg = np.repeat(np.arange(r), D)
        m = jnp.asarray((seg[:, None] == seg[None, :]).astype(np.float32) / D)
        in_specs.append(pl.BlockSpec((d_eff, d_eff), lambda i: (0, 0)))  # resident
        operands.append(m)
        kernel = functools.partial(_ln_folded_kernel, eps=eps)
    else:
        kernel = functools.partial(_ln_rows_kernel, eps=eps, inv_d=1.0 / D)

    out = pl.pallas_call(
        kernel,
        out_shape=jax.ShapeDtypeStruct((rows, d_eff), dtype),
        grid_spec=pltpu.PrefetchScalarGridSpec(
            num_scalar_prefetch=0,
            grid=grid,
            in_specs=in_specs,
            out_specs=pl.BlockSpec((tn, d_eff), lambda i: (i, 0)),
        ),
        compiler_params=pltpu.CompilerParams(
            dimension_semantics=("parallel",)),
    )(*operands)

    return out.reshape(N, D) if fold else out


def tree_layer_norm_ref(h, eps: float = 1e-5):
    """Pure-JAX reference mirroring torch.nn.LayerNorm(D)(h) (fresh params)."""
    h32 = h.astype(jnp.float32)
    mean = jnp.mean(h32, axis=-1, keepdims=True)
    var = jnp.mean((h32 - mean) ** 2, axis=-1, keepdims=True)
    return ((h32 - mean) / jnp.sqrt(var + eps)).astype(h.dtype)


if __name__ == "__main__":
    key = jax.random.PRNGKey(0)

    # Small "degree bucket" shapes:
    #   (16, 32)  tiny bucket, folded lane-dense path, single partial block
    #   (300, 32) folded path with a partial last block (no host padding)
    #   (15, 48)  fallback per-row path (128 % 48 != 0 -> no fold)
    shapes = [(16, 32), (300, 32), (15, 48)]
    for N, D in shapes:
        key, sub = jax.random.split(key)
        h = jax.random.normal(sub, (N, D), dtype=jnp.float32)

        out = jax.block_until_ready(tree_layer_norm(h))
        ref = jax.block_until_ready(tree_layer_norm_ref(h))

        np.testing.assert_allclose(np.asarray(out), np.asarray(ref),
                                   rtol=1e-4, atol=1e-4)

    print("KERNEL_OK")
</pallas_src>

<mosaic_0001>
module attributes {stable_mosaic.version = 11 : i64} {
  func.func @_ln_folded_kernel(%arg0: i32, %arg1: memref<8x128xf32, #tpu.memory_space<vmem>>, %arg2: memref<128x128xf32, #tpu.memory_space<vmem>>, %arg3: memref<8x128xf32, #tpu.memory_space<vmem>>) attributes {dimension_semantics = [#tpu.dimension_semantics<parallel>], iteration_bounds = array<i64: 1>, scalar_prefetch = 0 : i64, scratch_operands = 0 : i64, tpu.core_type = #tpu.core_type<tc>, window_params = [{transform_indices = @transform_0, window_bounds = array<i64: 8, 128>}, {pipeline_mode = #tpu.pipeline_mode<synchronous>, transform_indices = @transform_1, window_bounds = array<i64: 128, 128>}, {transform_indices = @transform_2, window_bounds = array<i64: 8, 128>}]} {
    %c0 = arith.constant 0 : index
    %c0_0 = arith.constant 0 : index
    %0 = vector.load %arg1[%c0, %c0_0] : memref<8x128xf32, #tpu.memory_space<vmem>>, vector<8x128xf32>
    %c0_1 = arith.constant 0 : index
    %c0_2 = arith.constant 0 : index
    %1 = vector.load %arg2[%c0_1, %c0_2] : memref<128x128xf32, #tpu.memory_space<vmem>>, vector<128x128xf32>
    %cst = arith.constant dense<0.000000e+00> : vector<8x128xf32>
    %2 = tpu.matmul %0, %1, %cst {dimension_numbers = #tpu.dot_dimension_numbers<[1], [0], [0], [1], [0, 0, 1, 1], [], []>} : vector<8x128xf32>, vector<128x128xf32>, vector<8x128xf32> -> vector<8x128xf32>
    %3 = arith.mulf %0, %0 : vector<8x128xf32>
    %cst_3 = arith.constant dense<0.000000e+00> : vector<8x128xf32>
    %4 = tpu.matmul %3, %1, %cst_3 {dimension_numbers = #tpu.dot_dimension_numbers<[1], [0], [0], [1], [0, 0, 1, 1], [], []>} : vector<8x128xf32>, vector<128x128xf32>, vector<8x128xf32> -> vector<8x128xf32>
    %5 = arith.mulf %2, %2 : vector<8x128xf32>
    %6 = arith.subf %4, %5 : vector<8x128xf32>
    %cst_4 = arith.constant 0.000000e+00 : f32
    %7 = vector.broadcast %cst_4 : f32 to vector<8x128xf32>
    %8 = arith.maximumf %6, %7 : vector<8x128xf32>
    %cst_5 = arith.constant 9.99999974E-6 : f32
    %9 = vector.broadcast %cst_5 : f32 to vector<8x128xf32>
    %10 = arith.addf %8, %9 : vector<8x128xf32>
    %11 = math.rsqrt %10 : vector<8x128xf32>
    %12 = arith.subf %0, %2 : vector<8x128xf32>
    %13 = arith.mulf %12, %11 : vector<8x128xf32>
    %c0_6 = arith.constant 0 : index
    %c0_7 = arith.constant 0 : index
    %14 = vector.load %arg3[%c0_6, %c0_7] : memref<8x128xf32, #tpu.memory_space<vmem>>, vector<8x128xf32>
    tpu.vector_store %arg3[%c0_6, %c0_7], %13 {strides = array<i32>} : memref<8x128xf32, #tpu.memory_space<vmem>>, vector<8x128xf32>,
    return
  }
  func.func @transform_0(%arg0: i32) -> (i32, i32) {
    %c0_i32 = arith.constant 0 : i32
    %c0_i32_0 = arith.constant 0 : i32
    return %arg0, %c0_i32 : i32, i32
  }
  func.func @transform_1(%arg0: i32) -> (i32, i32) {
    %c0_i32 = arith.constant 0 : i32
    %c0_i32_0 = arith.constant 0 : i32
    %c0_i32_1 = arith.constant 0 : i32
    return %c0_i32, %c0_i32_0 : i32, i32
  }
  func.func @transform_2(%arg0: i32) -> (i32, i32) {
    %c0_i32 = arith.constant 0 : i32
    %c0_i32_0 = arith.constant 0 : i32
    return %arg0, %c0_i32 : i32, i32
  }
}

</mosaic_0001>

<bundles_post_ra>
// kernel: tpu_custom_call.1
= control target key start
LH: loop header
LB: loop body
LE: loop exit
PB: predicated region body
PF: predicated region fallthrough
CT: control target
= control target key end

     0   :  { %7 = vsyncpa [#allocation3], 0  ;;  %s478_s0 = inlined_call_operand.hbm [shape: f32[4,128], index: 0, kind: input, shape index: {}]   ;;  %s479_s1 = inlined_call_operand.hbm [shape: f32[128,128], index: 1, kind: input, shape index: {}]   ;;  %s480_s2 = inlined_call_operand.hbm [shape: f32[4,128], index: 2, kind: output, shape index: {}]  }
   0x1   :  { %8 = vsyncpa [#allocation6], 0 }
   0x2   :  { %9 = vsyncpa [#allocation4], 0 }
   0x3   :  { %14 = vsyncadd [#allocation3], 64  ;;  %s405_s9 = smov [#allocation2]  }
   0x4   :  { %s15_s10 = sshll.u32 %s405_s9, 4  ;;  %s16_s10 = int_to_ptr.vmem [resolvable:$true] %s15_s10 }
   0x5   :  { %s347_s11 = scalar_lea.vmem %s16_s10, 64  ;;  %s351_s12 = scalar_lea.vmem %s16_s10, 128 }
   0x6   :  { %p348_p0 = scmp.ne.s32.totalorder %s16_s10, %s347_s11  ;;  %p352_p1 = scmp.lt.s32.totalorder %s16_s10, %s16_s10 }
   0x7   :  { %p353_p2 = scmp.lt.s32.totalorder %s351_s12, %s347_s11 }
   0x9   :  { %p354_p3 = por %p353_p2, %p352_p1 }
   0xb   :  { %p355_p4 = pnand %p354_p3, %p348_p0 }
   0xd   :  { %358 = shalt.err (!%p355_p4)
}
   0xe   :  { %s406_s13 = smov 64   ;;  %s407_s14 = smov 4  }
   0xf   :  { %21 = dma.hbm_to_vmem [thread:$0]  %s478_s0, 64, %s16_s10, [#allocation3], %s406_s13, %s406_s13, %s407_s14  }
  0x10   :  { %s408_s17 = smov [#allocation5]  }
  0x11   :  { %s27_s18 = sshll.u32 %s408_s17, 4  ;;  %s28_s18 = int_to_ptr.vmem [resolvable:$true] %s27_s18 }
  0x12   :  { %s367_s19 = scalar_lea.vmem %s28_s18, 2048  ;;  %p372_p6 = scmp.lt.s32.totalorder %s28_s18, %s28_s18 }
  0x13   :  { %p368_p5 = scmp.ne.s32.totalorder %s28_s18, %s367_s19  ;;  %p373_p7 = scmp.lt.s32.totalorder %s367_s19, %s367_s19 }
  0x15   :  { %p374_p8 = por %p373_p7, %p372_p6 }
  0x17   :  { %p375_p9 = pnand %p374_p8, %p368_p5 }
  0x19   :  { %378 = shalt.err (!%p375_p9)
}
  0x1a   :  { %s409_s20 = smov 128   ;;  %s410_s21 = smov 8  }
  0x1b   :  { %33 = dma.hbm_to_vmem [thread:$0]  %s479_s1, 2048, %s28_s18, [#allocation6], %s409_s20, %s409_s20, %s410_s21  }
  0x1c   :  { %399 = dma.done.wait [#allocation3], 128  }
  0x1d   :  { %400 = vsyncadd [#allocation3], 4294967168 }
  0x1e   :  { %401 = dma.done.wait [#allocation6], 2048  }
  0x1f   :  { %402 = vsyncadd [#allocation6], 4294965248  ;;  %v411_v0 = vmov 0.0   ;;  %vm412_vm0 = vmmov 0   ;;  %v56_v1 = vld [vmem:[#allocation5 + $0x78] sm:$0xff]  ;;  %v55_v2 = vld [vmem:[#allocation5 + $0x70] sm:$0xff] }
  0x20   :  { %258 = vmatprep.subr.mxu0 %v411_v0  ;;  %293 = vmatprep.subr.mxu1 %v411_v0  ;;  %v54_v3 = vld [vmem:[#allocation5 + $0x68] sm:$0xff]  ;;  %v53_v4 = vld [vmem:[#allocation5 + $0x60] sm:$0xff]  ;;  %v52_v5 = vld [vmem:[#allocation5 + $0x58] sm:$0xff] }
  0x21   :  { %290 = vmatprep.mubr.msk.f32.mxu0 %vm412_vm0, %v411_v0  ;;  %325 = vmatprep.mubr.msk.f32.mxu1 %vm412_vm0, %v411_v0  ;;  %v51_v6 = vld [vmem:[#allocation5 + $0x50] sm:$0xff]  ;;  %v50_v7 = vld [vmem:[#allocation5 + $0x48] sm:$0xff]  ;;  %v49_v8 = vld [vmem:[#allocation5 + $0x40] sm:$0xff] }
  0x22   :  { %259 = vmatpush3.msra.mxu0 %v56_v1  ;;  %294 = vmatpush3.msra.mxu1 %v56_v1  ;;  %v48_v9 = vld [vmem:[#allocation5 + $0x38] sm:$0xff]  ;;  %v47_v10 = vld [vmem:[#allocation5 + $0x30] sm:$0xff]  ;;  %v46_v11 = vld [vmem:[#allocation5 + $0x28] sm:$0xff] }
  0x23   :  { %260 = vmatprep.subr.mxu0 %v411_v0  ;;  %295 = vmatprep.subr.mxu1 %v411_v0  ;;  %v45_v12 = vld [vmem:[#allocation5 + $0x20] sm:$0xff]  ;;  %v44_v13 = vld [vmem:[#allocation5 + $0x18] sm:$0xff]  ;;  %v43_v14 = vld [vmem:[#allocation5 + $0x10] sm:$0xff] }
  0x24   :  { %261 = vmatpush3.msra.mxu0 %v55_v2  ;;  %296 = vmatpush3.msra.mxu1 %v55_v2  ;;  %v40_v15 = vld [vmem:[#allocation2] sm:$0xff]  ;;  %v42_v16 = vld [vmem:[#allocation5 + $0x8] sm:$0xff]  ;;  %v41_v17 = vld [vmem:[#allocation5] sm:$0xff] }
  0x25   :  { %262 = vmatprep.subr.mxu0 %v411_v0  ;;  %297 = vmatprep.subr.mxu1 %v411_v0  ;;  %v127_v18 = vmul.f32 %v40_v15, %v40_v15 }
  0x26   :  { %263 = vmatpush3.msra.mxu0 %v54_v3  ;;  %298 = vmatpush3.msra.mxu1 %v54_v3 }
  0x27   :  { %264 = vmatprep.subr.mxu0 %v411_v0  ;;  %299 = vmatprep.subr.mxu1 %v411_v0 }
  0x28   :  { %265 = vmatpush3.msra.mxu0 %v53_v4  ;;  %300 = vmatpush3.msra.mxu1 %v53_v4 }
  0x29   :  { %266 = vmatprep.subr.mxu0 %v411_v0  ;;  %301 = vmatprep.subr.mxu1 %v411_v0 }
  0x2a   :  { %267 = vmatpush3.msra.mxu0 %v52_v5  ;;  %302 = vmatpush3.msra.mxu1 %v52_v5 }
  0x2b   :  { %268 = vmatprep.subr.mxu0 %v411_v0  ;;  %303 = vmatprep.subr.mxu1 %v411_v0 }
  0x2c   :  { %269 = vmatpush3.msra.mxu0 %v51_v6  ;;  %304 = vmatpush3.msra.mxu1 %v51_v6 }
  0x2d   :  { %270 = vmatprep.subr.mxu0 %v411_v0  ;;  %305 = vmatprep.subr.mxu1 %v411_v0 }
  0x2e   :  { %271 = vmatpush3.msra.mxu0 %v50_v7  ;;  %306 = vmatpush3.msra.mxu1 %v50_v7 }
  0x2f   :  { %272 = vmatprep.subr.mxu0 %v411_v0  ;;  %307 = vmatprep.subr.mxu1 %v411_v0 }
  0x30   :  { %273 = vmatpush3.msra.mxu0 %v49_v8  ;;  %308 = vmatpush3.msra.mxu1 %v49_v8 }
  0x31   :  { %274 = vmatprep.subr.mxu0 %v411_v0  ;;  %309 = vmatprep.subr.mxu1 %v411_v0 }
  0x32   :  { %275 = vmatpush3.msra.mxu0 %v48_v9  ;;  %310 = vmatpush3.msra.mxu1 %v48_v9 }
  0x33   :  { %276 = vmatprep.subr.mxu0 %v411_v0  ;;  %311 = vmatprep.subr.mxu1 %v411_v0 }
  0x34   :  { %277 = vmatpush3.msra.mxu0 %v47_v10  ;;  %312 = vmatpush3.msra.mxu1 %v47_v10 }
  0x35   :  { %278 = vmatprep.subr.mxu0 %v411_v0  ;;  %313 = vmatprep.subr.mxu1 %v411_v0 }
  0x36   :  { %279 = vmatpush3.msra.mxu0 %v46_v11  ;;  %314 = vmatpush3.msra.mxu1 %v46_v11 }
  0x37   :  { %280 = vmatprep.subr.mxu0 %v411_v0  ;;  %315 = vmatprep.subr.mxu1 %v411_v0 }
  0x38   :  { %281 = vmatpush3.msra.mxu0 %v45_v12  ;;  %316 = vmatpush3.msra.mxu1 %v45_v12 }
  0x39   :  { %282 = vmatprep.subr.mxu0 %v411_v0  ;;  %317 = vmatprep.subr.mxu1 %v411_v0 }
  0x3a   :  { %283 = vmatpush3.msra.mxu0 %v44_v13  ;;  %318 = vmatpush3.msra.mxu1 %v44_v13 }
  0x3b   :  { %284 = vmatprep.subr.mxu0 %v411_v0  ;;  %319 = vmatprep.subr.mxu1 %v411_v0 }
  0x3c   :  { %285 = vmatpush3.msra.mxu0 %v43_v14  ;;  %320 = vmatpush3.msra.mxu1 %v43_v14 }
  0x3d   :  { %286 = vmatprep.subr.mxu0 %v411_v0  ;;  %321 = vmatprep.subr.mxu1 %v411_v0 }
  0x3e   :  { %287 = vmatpush3.msra.mxu0 %v42_v16  ;;  %322 = vmatpush3.msra.mxu1 %v42_v16 }
  0x3f   :  { %288 = vmatprep.subr.mxu0 %v411_v0  ;;  %323 = vmatprep.subr.mxu1 %v411_v0 }
  0x40   :  { %289 = vmatpush3.msra.mxu0 %v41_v17  ;;  %324 = vmatpush3.msra.mxu1 %v41_v17 }
  0x41   :  { %291 = vmatmul.mubr.f32.vlgmr.msra.gmra.mxu0 %v40_v15  ;;  %326 = vmatmul.mubr.f32.vlgmr.msra.gmra.mxu1 %v127_v18 }
 0x101   :  { %v123_v19 = vpop.f32.mrf.mxu0  ;;  %v194_v20 = vpop.f32.mrf.mxu1 }
 0x102   :  { %v198_v21 = vmul.f32 %v123_v19, %v123_v19  ;;  %v203_v27 = vsub.f32 %v40_v15, %v123_v19 }
 0x103   :  { %v292_v22 = vpop.f32.mrf.mxu0  ;;  %v327_v23 = vpop.f32.mrf.mxu1 }
 0x104   :  { %v199_v24 = vsub.f32 %v194_v20, %v198_v21 }
 0x106   :  { %v200_v25 = vmax.f32 %v199_v24, 0.0 }
 0x108   :  { %v201_v26 = vadd.f32 1e-05, %v200_v25 }
 0x10a   :  { %337 = vrsqrt.f32 %v201_v26 }
 0x117   :  { %v338_v28 = vpop.eup %337 }
 0x118   :  { %v204_v29 = vmul.f32 %v338_v28, %v203_v27 }
 0x11a   :  { %205 = vst [vmem:[#allocation7] sm:$0xff] %v204_v29 }
 0x11b   :  { %210 = vsyncadd [#allocation4], 64  ;;  %s413_s0 = smov [#allocation7]  }
 0x11c   :  { %s211_s1 = sshll.u32 %s413_s0, 4  ;;  %s212_s1 = int_to_ptr.vmem [resolvable:$true] %s211_s1 }
 0x11d   :  { %s379_s24 = scalar_lea.vmem %s212_s1, 64  ;;  %s383_s25 = scalar_lea.vmem %s212_s1, 128 }
 0x11e   :  { %p380_p10 = scmp.ne.s32.totalorder %s212_s1, %s379_s24  ;;  %p384_p11 = scmp.lt.s32.totalorder %s212_s1, %s212_s1 }
 0x11f   :  { %p385_p12 = scmp.lt.s32.totalorder %s383_s25, %s379_s24 }
 0x121   :  { %p386_p13 = por %p385_p12, %p384_p11 }
 0x123   :  { %p387_p0 = pnand %p386_p13, %p380_p10 }
 0x125   :  { %390 = shalt.err (!%p387_p0)
}
 0x126   :  { %217 = dma.vmem_to_hbm [thread:$0]  %s212_s1, 64, %s480_s2, [#allocation4], %s406_s13, %s406_s13, %s407_s14  }
 0x127   :  { %403 = dma.done.wait [#allocation4], 128  }
 0x128   :  { %404 = vsyncadd [#allocation4], 4294967168 }
 0x129   :  { %221 = vsyncpa [#allocation3], 1 }
 0x12a   :  { %222 = vsyncpa [#allocation6], 1 }
 0x12b   :  { %223 = vsyncpa [#allocation4], 1 }

</bundles_post_ra>
